<compile_context>
chip_gen: v5e
topology: v5e:2x2
jax: 0.10.0
libtpu: 0.0.40
codegen_flags: <defaults>
</compile_context>

<pallas_src>
import numpy as np

import jax
import jax.numpy as jnp
from jax import lax
from jax.experimental import pallas as pl
from jax.experimental.pallas import tpu as pltpu


# ----------------------------------------------------------------------------
# Plain-JAX glue: sampling & grouping (data-dependent gathers, no hot compute)
# ----------------------------------------------------------------------------
def index_points(points, idx):
    """points: [B, N, C], idx: [B, ...] -> [B, ..., C]  (matches torch gather)."""
    B = points.shape[0]
    flat = idx.reshape(B, -1)
    out = jnp.take_along_axis(points, flat[..., None], axis=1)
    return out.reshape(*idx.shape, points.shape[-1])


def index_points_group_major(points, grouped_idx):
    """points [B,N,C], grouped_idx [B,S,K] -> [K,B,S,C].

    The gather itself produces the group-major layout the Pallas kernel wants,
    so no extra HBM transpose pass over the grouped tensor is needed.
    """
    idx_km = jnp.transpose(grouped_idx, (2, 0, 1))            # [K,B,S]  (tiny)
    return jax.vmap(lambda ix: index_points(points, ix))(idx_km)


def farthest_point_sample(xyz, npoint, key):
    """xyz: [B, N, 3] -> [B, npoint] int32 indices."""
    # TODO(synk): PyTorch seeds the first centroid with torch.randint; here we
    # use a fixed JAX PRNG key, so the RNG source (not the algorithm) differs.
    B, N, _ = xyz.shape
    farthest = jax.random.randint(key, (B,), 0, N).astype(jnp.int32)
    distance = jnp.full((B, N), 1e10, jnp.float32)
    centroids = jnp.zeros((B, npoint), jnp.int32)

    def body(i, carry):
        centroids, distance, farthest = carry
        centroids = centroids.at[:, i].set(farthest)
        centroid = index_points(xyz, farthest)[:, None, :]           # [B,1,3]
        dist = jnp.sqrt(jnp.sum((xyz - centroid) ** 2, axis=-1))     # cdist
        distance = jnp.minimum(distance, dist)
        farthest = jnp.argmax(distance, axis=-1).astype(jnp.int32)
        return centroids, distance, farthest

    centroids, _, _ = lax.fori_loop(0, npoint, body,
                                    (centroids, distance, farthest))
    return centroids


def knn_idx(p1, p2, k):
    """Squared-distance kNN of p1 [B,S,3] into p2 [B,N,3] -> (sq_dists, idx)."""
    sq = jnp.sum((p1[:, :, None, :] - p2[:, None, :, :]) ** 2, axis=-1)
    neg, idx = lax.top_k(-sq, k)
    return -neg, idx.astype(jnp.int32)


def query_ball_point(radius, nsample, xyz, new_xyz):
    # Matches the module spec: kNN, then out-of-radius hits replaced by the
    # first (nearest) index.
    vals, idx = knn_idx(new_xyz, xyz, nsample)
    return jnp.where(vals < radius ** 2, idx, idx[:, :, :1])


def _group_indices(nsample, group_radius, ngroup, xyz, knn, key):
    """Shared FPS + grouping index computation (used by kernel & reference)."""
    fps_idx = farthest_point_sample(xyz, nsample, key)
    sampled_xyz = index_points(xyz, fps_idx)                          # [B,S,3]
    if knn:
        _, grouped_idx = knn_idx(sampled_xyz, xyz, ngroup)
    else:
        grouped_idx = query_ball_point(group_radius, ngroup, xyz, sampled_xyz)
    return sampled_xyz, grouped_idx


def sample_and_group(nsample, group_radius, ngroup, xyz, points_fea, knn, key):
    """Standard [B,S,K,3+D] f32 grouping (used by the f32 reference path)."""
    sampled_xyz, grouped_idx = _group_indices(nsample, group_radius, ngroup,
                                              xyz, knn, key)
    grouped_xyz = index_points(xyz, grouped_idx)                      # [B,S,K,3]
    grouped_xyz_norm = grouped_xyz - sampled_xyz[:, :, None, :]
    if points_fea is not None:
        grouped_points = index_points(points_fea, grouped_idx)
        new_points = jnp.concatenate([grouped_xyz_norm, grouped_points], -1)
    else:
        new_points = grouped_xyz_norm
    return sampled_xyz, new_points


def sample_and_group_group_major(nsample, group_radius, ngroup, xyz, points_fea,
                                 knn, key, compute_dtype=jnp.bfloat16):
    """Group-major, kernel-ready grouping.

    Returns (sampled_xyz f32 [B,S,3], grouped_km compute_dtype [K,B,S,3+D]).
    The gathers emit the group-major layout directly and the (large) feature
    part is gathered from a pre-cast bf16 source, so the biggest grouped
    tensor is written to HBM exactly once, already in kernel layout/dtype.
    """
    sampled_xyz, grouped_idx = _group_indices(nsample, group_radius, ngroup,
                                              xyz, knn, key)
    # xyz part is tiny (3 channels): keep the centering subtraction in f32 and
    # cast only the result (same numerics as the f32 reference path).
    grouped_xyz = index_points_group_major(xyz, grouped_idx)          # [K,B,S,3]
    grouped_xyz_norm = (grouped_xyz - sampled_xyz[None]).astype(compute_dtype)
    if points_fea is not None:
        grouped_points = index_points_group_major(
            points_fea.astype(compute_dtype), grouped_idx)            # [K,B,S,D]
        grouped_km = jnp.concatenate([grouped_xyz_norm, grouped_points], -1)
    else:
        grouped_km = grouped_xyz_norm
    return sampled_xyz, grouped_km


def sample_and_group_all(xyz, points_fea):
    B, N, _ = xyz.shape
    new_xyz = jnp.zeros((B, 1, 3), xyz.dtype)
    grouped_xyz = xyz[:, None, :, :]
    if points_fea is not None:
        new_points = jnp.concatenate(
            [grouped_xyz, points_fea[:, None, :, :]], axis=-1)
    else:
        new_points = grouped_xyz
    return new_xyz, new_points


def sample_and_group_all_group_major(xyz, points_fea,
                                     compute_dtype=jnp.bfloat16):
    """group_all variant, group-major: returns [N, B, 1, 3+D] in compute dtype."""
    B, N, _ = xyz.shape
    new_xyz = jnp.zeros((B, 1, 3), xyz.dtype)
    gx = jnp.transpose(xyz, (1, 0, 2))[:, :, None, :].astype(compute_dtype)
    if points_fea is not None:
        gp = jnp.transpose(points_fea, (1, 0, 2))[:, :, None, :].astype(
            compute_dtype)
        grouped_km = jnp.concatenate([gx, gp], axis=-1)
    else:
        grouped_km = gx
    return new_xyz, grouped_km


# ----------------------------------------------------------------------------
# Parameter prep: fold BN (eval) scale into weights, pad channels to 128
# ----------------------------------------------------------------------------
def _round_up(x, m):
    return (x + m - 1) // m * m


def _prepare_params(weights, scales, shifts, compute_dtype):
    """Return folded (bf16) weights and f32 shifts, channel-padded to 128.

    Padding is exact: padded output channels have zero weight columns and zero
    shift, so they stay 0 through ReLU and the max, and padded weight rows of
    the next layer are zero as well.
    """
    folded_w, folded_b = [], []
    prev_pad = weights[0].shape[0]          # input channels (not padded)
    for w, sc, sh in zip(weights, scales, shifts):
        cin, cout = w.shape
        cout_pad = _round_up(cout, 128)
        wf = (w.astype(jnp.float32) * sc.astype(jnp.float32)[None, :])
        wf = jnp.pad(wf, ((0, prev_pad - cin), (0, cout_pad - cout)))
        bf = jnp.pad(sh.astype(jnp.float32), (0, cout_pad - cout))
        folded_w.append(wf.astype(compute_dtype))
        folded_b.append(bf.reshape(1, cout_pad))
        prev_pad = cout_pad
    return folded_w, folded_b


# ----------------------------------------------------------------------------
# VMEM model & tile selection (per-generation, lane/sublane aware)
# ----------------------------------------------------------------------------
def _vmem_capacity_bytes(default=64 * 1024 * 1024):
    """Per-core VMEM capacity; conservative fallback if the query is missing."""
    try:
        info = pltpu.get_tpu_info()
        cap = getattr(info, "vmem_capacity_bytes", None)
        if cap:
            return int(cap)
    except Exception:
        pass
    return default


def _vmem_need_bytes(rt, kc, Cin, cs_pad, itemsize):
    """Conservative VMEM estimate for one grid step.

    Counts lane padding (Cin rounded to 128), sublane padding of the input
    block, double-buffering of inputs/weights/output, the full live f32
    activation set for the Kc*row_tile rows plus its bf16 recast, the
    first-layer operand, and the running-max scratch.
    """
    sub = 32 // itemsize                      # 16 for bf16, 8 for f32
    cin_lane = _round_up(Cin, 128)
    rt_sub = _round_up(rt, sub)
    m = kc * rt
    cout_pad = cs_pad[-1]

    need = 2 * kc * rt_sub * cin_lane * itemsize          # input block x2
    prev = cin_lane
    for c in cs_pad:                                      # weights + biases x2
        need += 2 * (prev * c * itemsize + 8 * c * 4)
        prev = c
    cs_sorted = sorted(cs_pad, reverse=True)
    c1 = cs_sorted[0]
    c2 = cs_sorted[1] if len(cs_sorted) > 1 else cs_sorted[0]
    need += m * (c1 * 4 + c1 * itemsize + c2 * 4)         # live f32/bf16 acts
    need += m * cin_lane * itemsize                       # first-layer operand
    need += rt * cout_pad * 4 * 3                         # out x2 + max scratch
    return need


def _pick_tiles(R, K, Cin, cs_pad, compute_dtype, budget_bytes):
    """Pick (row_tile, k_chunk).

    row_tile: multiple of 128 preferred (MXU-full tiles, lane-dense stores),
      else a multiple of 16 (bf16 sublane tile) so the (Kc,row_tile,Cin) ->
      (Kc*row_tile,Cin) collapse and the final split stay layout-trivial.
    k_chunk: exact divisor of K; K is chunked over the trailing "arbitrary"
      grid axis when all-K-live f32 activations would blow the VMEM budget
      (matters most on v7x with 64 MiB VMEM per TensorCore).
    Preference: maximize the matmul M = row_tile * k_chunk (fewest grid steps,
      biggest MXU tiles), tie-break on larger row_tile (fewer output writes).
    """
    itemsize = jnp.dtype(compute_dtype).itemsize

    if R < 16:
        row_cands = [R]                       # block equals the full row extent
    else:
        rt_cap = min(1024, (R // 16) * 16)
        if R >= 1024:
            # keep >= 4 row grid steps so megacore (v7x) can shard the row axis
            rt_cap = min(rt_cap, max(128, (R // 4) // 128 * 128))
        row_cands = list(range((rt_cap // 128) * 128, 127, -128))
        row_cands += list(range(min((rt_cap // 16) * 16, 112), 15, -16))
        if not row_cands:
            row_cands = [16]

    kdivs = [d for d in range(K, 0, -1) if K % d == 0]

    best = None                               # ((M, rt), rt, kc)
    for rt in row_cands:
        for kc in kdivs:                      # descending: first fit = max kc
            if _vmem_need_bytes(rt, kc, Cin, cs_pad, itemsize) <= budget_bytes:
                key = (rt * kc, rt)
                if best is None or key > best[0]:
                    best = (key, rt, kc)
                break
    if best is not None:
        return best[1], best[2]
    # Nothing fits the (conservative) budget: fall back to the smallest tile
    # and rely on the 2x headroom between budget and vmem_limit_bytes.
    return row_cands[-1], kdivs[-1]


# ----------------------------------------------------------------------------
# Pallas kernel: fused (Conv1x1 -> BN(eval) -> ReLU) x L -> max over group
# ----------------------------------------------------------------------------
def _make_mlp_max_kernel(num_layers, k_chunk, row_tile, n_k_steps,
                         compute_dtype):
    use_scratch = n_k_steps > 1

    def kernel(x_ref, *refs):
        if use_scratch:
            *wb_refs, out_ref, max_ref = refs
        else:
            *wb_refs, out_ref = refs
        w_refs = wb_refs[0::2]
        b_refs = wb_refs[1::2]

        # [Kc, row_tile, Cin] -> [Kc*row_tile, Cin]: layout-trivial collapse
        # (row_tile is a multiple of the bf16 sublane tile for non-tiny R).
        cin = x_ref.shape[-1]
        h = x_ref[...].reshape(k_chunk * row_tile, cin)
        acc = None
        for l in range(num_layers):
            acc = jnp.dot(h, w_refs[l][...],
                          preferred_element_type=jnp.float32)
            # BN scale pre-folded into W; epilogue stays in f32 (v5e-friendly).
            acc = jnp.maximum(acc + b_refs[l][...], 0.0)
            if l + 1 < num_layers:
                h = acc.astype(compute_dtype)

        # Max over the groups in this K chunk (rows are group-major).
        acc = acc.reshape(k_chunk, row_tile, acc.shape[-1])
        chunk_max = jnp.max(acc, axis=0)

        if use_scratch:
            kc_idx = pl.program_id(1)

            @pl.when(kc_idx == 0)
            def _():
                # ReLU output is >= 0, so 0 is an exact identity for the max.
                max_ref[...] = jnp.zeros_like(max_ref)

            max_ref[...] = jnp.maximum(max_ref[...], chunk_max)

            @pl.when(kc_idx == n_k_steps - 1)
            def _():
                out_ref[...] = max_ref[...].astype(out_ref.dtype)
        else:
            out_ref[...] = chunk_max.astype(out_ref.dtype)

    return kernel


def mlp_max_pallas(grouped_km, weights, scales, shifts, *, row_tile=None,
                   k_chunk=None, compute_dtype=jnp.bfloat16,
                   return_padded_channels=False):
    """grouped_km: [K, B, S, C_in] (group-major)  ->  [B, S, C_last]  (f32).

    Equivalent to PyTorch's permute(0,3,2,1) + 1x1 convs + BN(eval) + ReLU
    stack followed by max over the group dim, computed channels-last.
    """
    K, B, S, Cin = grouped_km.shape
    R = B * S
    L = len(weights)
    Cout = weights[-1].shape[1]

    folded_w, folded_b = _prepare_params(weights, scales, shifts, compute_dtype)
    cs_pad = [w.shape[1] for w in folded_w]
    Cout_pad = cs_pad[-1]

    # Per-generation VMEM limit (~70% of capacity) and tiling budget (~half).
    vmem_cap = _vmem_capacity_bytes()
    vmem_limit = (vmem_cap * 7) // 10
    budget = vmem_limit // 2

    if row_tile is None or k_chunk is None:
        rt, kc = _pick_tiles(R, K, Cin, cs_pad, compute_dtype, budget)
        row_tile = row_tile if row_tile is not None else rt
        k_chunk = k_chunk if k_chunk is not None else kc
    assert K % k_chunk == 0, \
        "k_chunk must divide K exactly (ragged K chunks would corrupt the max)"
    n_k_steps = K // k_chunk

    # [K, B, S, Cin] -> [K, R, Cin]: contiguous dim merge, free.
    x = grouped_km.reshape(K, R, Cin)
    if x.dtype != compute_dtype:
        x = x.astype(compute_dtype)

    in_specs = [pl.BlockSpec((k_chunk, row_tile, Cin), lambda i, k: (k, i, 0))]
    args = [x]
    for wf, bf in zip(folded_w, folded_b):
        in_specs.append(pl.BlockSpec(wf.shape, lambda i, k: (0, 0)))
        in_specs.append(pl.BlockSpec(bf.shape, lambda i, k: (0, 0)))
        args += [wf, bf]

    scratch_shapes = []
    if n_k_steps > 1:
        scratch_shapes.append(pltpu.VMEM((row_tile, Cout_pad), jnp.float32))

    grid = (pl.cdiv(R, row_tile), n_k_steps)
    out = pl.pallas_call(
        _make_mlp_max_kernel(L, k_chunk, row_tile, n_k_steps, compute_dtype),
        out_shape=jax.ShapeDtypeStruct((R, Cout_pad), jnp.float32),
        grid=grid,
        in_specs=in_specs,
        out_specs=pl.BlockSpec((row_tile, Cout_pad), lambda i, k: (i, 0)),
        scratch_shapes=scratch_shapes,
        compiler_params=pltpu.CompilerParams(
            dimension_semantics=("parallel", "arbitrary"),
            vmem_limit_bytes=int(vmem_limit)),
    )(*args)

    out = out.reshape(B, S, Cout_pad)
    # For typical PointNet++ widths (Cout % 128 == 0) this is a no-op; callers
    # that can consume the padded layout can ask for it to skip the slice copy.
    if return_padded_channels or Cout == Cout_pad:
        return out
    return out[:, :, :Cout]


# ----------------------------------------------------------------------------
# Module-equivalent forward
# ----------------------------------------------------------------------------
def pointnet_set_abstraction_forward(xyz, points_fea, weights, scales, shifts,
                                     *, nsample, group_radius, ngroup,
                                     group_all, knn, fps_key,
                                     compute_dtype=jnp.bfloat16):
    if group_all:
        sampled_xyz, grouped_km = sample_and_group_all_group_major(
            xyz, points_fea, compute_dtype)
    else:
        sampled_xyz, grouped_km = sample_and_group_group_major(
            nsample, group_radius, ngroup, xyz, points_fea, knn, fps_key,
            compute_dtype)
    new_points = mlp_max_pallas(grouped_km, weights, scales, shifts,
                                compute_dtype=compute_dtype)
    return sampled_xyz, new_points


# ----------------------------------------------------------------------------
# Deterministic parameter init (Conv2d 1x1 + BatchNorm2d, eval-mode folded)
# ----------------------------------------------------------------------------
def init_params(key, in_channel, mlp):
    # TODO(synk): BatchNorm2d is reproduced in eval mode (running statistics);
    # training-mode batch statistics are not implemented.
    weights, scales, shifts = [], [], []
    last, eps = in_channel, 1e-5
    for out_c in mlp:
        key, k1, k2, k3, k4 = jax.random.split(key, 5)
        w = jax.random.normal(k1, (last, out_c), jnp.float32) / np.sqrt(last)
        b = 0.1 * jax.random.normal(k2, (out_c,), jnp.float32)
        gamma = 1.0 + 0.1 * jax.random.normal(k3, (out_c,), jnp.float32)
        beta = 0.1 * jax.random.normal(k4, (out_c,), jnp.float32)
        running_mean = jnp.zeros((out_c,), jnp.float32)
        running_var = jnp.ones((out_c,), jnp.float32)
        scale = gamma / jnp.sqrt(running_var + eps)
        shift = beta + (b - running_mean) * scale
        weights.append(w); scales.append(scale); shifts.append(shift)
        last = out_c
    return weights, scales, shifts


# ----------------------------------------------------------------------------
# Pure-JAX references for the kernel hot path
# ----------------------------------------------------------------------------
def ref_module_mlp_max(grouped, weights, scales, shifts):
    """f32 reference mirroring the PyTorch module math (grouped: [B,S,K,C])."""
    h = grouped.astype(jnp.float32)
    for w, sc, sh in zip(weights, scales, shifts):
        h = jnp.maximum(jnp.einsum('bskc,cd->bskd', h, w) * sc + sh, 0.0)
    return jnp.max(h, axis=2)


def ref_mlp_max_matched(grouped_km, weights, scales, shifts,
                        compute_dtype=jnp.bfloat16):
    """Reference mirroring the kernel math exactly (same bf16 folded operands).

    grouped_km: [K, B, S, C_in] group-major (same tensor the kernel consumes).
    """
    K, B, S, Cin = grouped_km.shape
    Cout = weights[-1].shape[1]
    fw, fb = _prepare_params(weights, scales, shifts, compute_dtype)
    h = grouped_km.reshape(K * B * S, Cin).astype(compute_dtype)
    acc = None
    for l, (w, b) in enumerate(zip(fw, fb)):
        acc = jnp.maximum(
            jnp.dot(h, w, preferred_element_type=jnp.float32) + b, 0.0)
        if l + 1 < len(fw):
            h = acc.astype(compute_dtype)
    acc = acc.reshape(K, B * S, -1)
    out = jnp.max(acc, axis=0)
    return out[:, :Cout].reshape(B, S, Cout)


if __name__ == "__main__":
    key = jax.random.PRNGKey(0)
    kx, kf, kp, kfps = jax.random.split(key, 4)

    # Small shapes consistent with the module.
    B, N, D = 2, 16, 4            # batch, points, feature channels
    nsample, group_radius, ngroup = 8, 0.5, 4
    mlp = [32, 64]
    in_channel = 3 + D            # grouped_xyz_norm (3) concat features (D)

    xyz = jax.random.normal(kx, (B, N, 3), jnp.float32)
    points_fea = jax.random.normal(kf, (B, N, D), jnp.float32)
    weights, scales, shifts = init_params(kp, in_channel, mlp)

    sampled_xyz, new_points = pointnet_set_abstraction_forward(
        xyz, points_fea, weights, scales, shifts,
        nsample=nsample, group_radius=group_radius, ngroup=ngroup,
        group_all=False, knn=False, fps_key=kfps)
    jax.block_until_ready((sampled_xyz, new_points))

    # ---- correctness of the Pallas hot path --------------------------------
    # Recompute the grouping with the same key (identical eager op sequence).
    _, grouped_km = sample_and_group_group_major(
        nsample, group_radius, ngroup, xyz, points_fea, knn=False, key=kfps)
    _, grouped_ref = sample_and_group(
        nsample, group_radius, ngroup, xyz, points_fea, knn=False, key=kfps)

    # (1) tight check vs a reference with identical bf16 folded math
    ref_m = ref_mlp_max_matched(grouped_km, weights, scales, shifts)
    np.testing.assert_allclose(np.asarray(new_points), np.asarray(ref_m),
                               rtol=1e-3, atol=1e-3)

    # (2) looser check vs the f32 module-style reference (bf16 operand rounding)
    ref_f = ref_module_mlp_max(grouped_ref, weights, scales, shifts)
    np.testing.assert_allclose(np.asarray(new_points), np.asarray(ref_f),
                               rtol=5e-2, atol=5e-2)

    # (3) exercise the K-chunked reduction path (v7x-style VMEM capping)
    out_chunked = mlp_max_pallas(grouped_km, weights, scales, shifts,
                                 row_tile=16, k_chunk=2)
    np.testing.assert_allclose(np.asarray(out_chunked), np.asarray(ref_m),
                               rtol=1e-3, atol=1e-3)

    # (4) group_all path (single group over all N points)
    sx_all, np_all = pointnet_set_abstraction_forward(
        xyz, points_fea, weights, scales, shifts,
        nsample=nsample, group_radius=group_radius, ngroup=ngroup,
        group_all=True, knn=False, fps_key=kfps)
    jax.block_until_ready(np_all)
    assert sx_all.shape == (B, 1, 3) and np_all.shape == (B, 1, mlp[-1])

    assert sampled_xyz.shape == (B, nsample, 3)
    assert new_points.shape == (B, nsample, mlp[-1])

    print("KERNEL_OK")
</pallas_src>

<mosaic_0001>
module attributes {stable_mosaic.version = 11 : i64} {
  func.func @kernel(%arg0: i32, %arg1: i32, %arg2: memref<4x16x7xbf16, #tpu.memory_space<vmem>>, %arg3: memref<7x128xbf16, #tpu.memory_space<vmem>>, %arg4: memref<1x128xf32, #tpu.memory_space<vmem>>, %arg5: memref<128x128xbf16, #tpu.memory_space<vmem>>, %arg6: memref<1x128xf32, #tpu.memory_space<vmem>>, %arg7: memref<16x128xf32, #tpu.memory_space<vmem>>) attributes {dimension_semantics = [#tpu.dimension_semantics<parallel>, #tpu.dimension_semantics<arbitrary>], iteration_bounds = array<i64: 1, 1>, scalar_prefetch = 0 : i64, scratch_operands = 0 : i64, tpu.core_type = #tpu.core_type<tc>, window_params = [{transform_indices = @transform_0, window_bounds = array<i64: 4, 16, 7>}, {pipeline_mode = #tpu.pipeline_mode<synchronous>, transform_indices = @transform_1, window_bounds = array<i64: 7, 128>}, {pipeline_mode = #tpu.pipeline_mode<synchronous>, transform_indices = @transform_2, window_bounds = array<i64: 1, 128>}, {pipeline_mode = #tpu.pipeline_mode<synchronous>, transform_indices = @transform_3, window_bounds = array<i64: 128, 128>}, {pipeline_mode = #tpu.pipeline_mode<synchronous>, transform_indices = @transform_4, window_bounds = array<i64: 1, 128>}, {transform_indices = @transform_5, window_bounds = array<i64: 16, 128>}]} {
    %c0 = arith.constant 0 : index
    %c0_0 = arith.constant 0 : index
    %c0_1 = arith.constant 0 : index
    %0 = vector.load %arg2[%c0, %c0_0, %c0_1] : memref<4x16x7xbf16, #tpu.memory_space<vmem>>, vector<4x16x7xbf16>
    %1 = vector.shape_cast %0 : vector<4x16x7xbf16> to vector<64x7xbf16>
    %c0_2 = arith.constant 0 : index
    %c0_3 = arith.constant 0 : index
    %2 = vector.load %arg3[%c0_2, %c0_3] : memref<7x128xbf16, #tpu.memory_space<vmem>>, vector<7x128xbf16>
    %cst = arith.constant dense<0.000000e+00> : vector<64x128xf32>
    %3 = tpu.matmul %1, %2, %cst {dimension_numbers = #tpu.dot_dimension_numbers<[1], [0], [0], [1], [0, 0, 1, 1], [], []>} : vector<64x7xbf16>, vector<7x128xbf16>, vector<64x128xf32> -> vector<64x128xf32>
    %c0_4 = arith.constant 0 : index
    %c0_5 = arith.constant 0 : index
    %4 = vector.load %arg4[%c0_4, %c0_5] : memref<1x128xf32, #tpu.memory_space<vmem>>, vector<1x128xf32>
    %5 = vector.broadcast %4 : vector<1x128xf32> to vector<64x128xf32>
    %6 = arith.addf %3, %5 : vector<64x128xf32>
    %cst_6 = arith.constant 0.000000e+00 : f32
    %7 = vector.broadcast %cst_6 : f32 to vector<64x128xf32>
    %8 = arith.maximumf %6, %7 : vector<64x128xf32>
    %9 = arith.truncf %8 : vector<64x128xf32> to vector<64x128xbf16>
    %c0_7 = arith.constant 0 : index
    %c0_8 = arith.constant 0 : index
    %10 = vector.load %arg5[%c0_7, %c0_8] : memref<128x128xbf16, #tpu.memory_space<vmem>>, vector<128x128xbf16>
    %cst_9 = arith.constant dense<0.000000e+00> : vector<64x128xf32>
    %11 = tpu.matmul %9, %10, %cst_9 {dimension_numbers = #tpu.dot_dimension_numbers<[1], [0], [0], [1], [0, 0, 1, 1], [], []>} : vector<64x128xbf16>, vector<128x128xbf16>, vector<64x128xf32> -> vector<64x128xf32>
    %c0_10 = arith.constant 0 : index
    %c0_11 = arith.constant 0 : index
    %12 = vector.load %arg6[%c0_10, %c0_11] : memref<1x128xf32, #tpu.memory_space<vmem>>, vector<1x128xf32>
    %13 = vector.broadcast %12 : vector<1x128xf32> to vector<64x128xf32>
    %14 = arith.addf %11, %13 : vector<64x128xf32>
    %cst_12 = arith.constant 0.000000e+00 : f32
    %15 = vector.broadcast %cst_12 : f32 to vector<64x128xf32>
    %16 = arith.maximumf %14, %15 : vector<64x128xf32>
    %17 = vector.shape_cast %16 : vector<64x128xf32> to vector<4x16x128xf32>
    %cst_13 = arith.constant dense<0xFF800000> : vector<16x128xf32>
    %18 = vector.multi_reduction <maximumf>, %17, %cst_13 [0] : vector<4x16x128xf32> to vector<16x128xf32>
    %c0_14 = arith.constant 0 : index
    %c0_15 = arith.constant 0 : index
    %19 = vector.load %arg7[%c0_14, %c0_15] : memref<16x128xf32, #tpu.memory_space<vmem>>, vector<16x128xf32>
    tpu.vector_store %arg7[%c0_14, %c0_15], %18 {strides = array<i32>} : memref<16x128xf32, #tpu.memory_space<vmem>>, vector<16x128xf32>,
    return
  }
  func.func @transform_0(%arg0: i32, %arg1: i32) -> (i32, i32, i32) {
    %c0_i32 = arith.constant 0 : i32
    %c0_i32_0 = arith.constant 0 : i32
    return %arg1, %arg0, %c0_i32 : i32, i32, i32
  }
  func.func @transform_1(%arg0: i32, %arg1: i32) -> (i32, i32) {
    %c0_i32 = arith.constant 0 : i32
    %c0_i32_0 = arith.constant 0 : i32
    %c0_i32_1 = arith.constant 0 : i32
    return %c0_i32, %c0_i32_0 : i32, i32
  }
  func.func @transform_2(%arg0: i32, %arg1: i32) -> (i32, i32) {
    %c0_i32 = arith.constant 0 : i32
    %c0_i32_0 = arith.constant 0 : i32
    %c0_i32_1 = arith.constant 0 : i32
    return %c0_i32, %c0_i32_0 : i32, i32
  }
  func.func @transform_3(%arg0: i32, %arg1: i32) -> (i32, i32) {
    %c0_i32 = arith.constant 0 : i32
    %c0_i32_0 = arith.constant 0 : i32
    %c0_i32_1 = arith.constant 0 : i32
    return %c0_i32, %c0_i32_0 : i32, i32
  }
  func.func @transform_4(%arg0: i32, %arg1: i32) -> (i32, i32) {
    %c0_i32 = arith.constant 0 : i32
    %c0_i32_0 = arith.constant 0 : i32
    %c0_i32_1 = arith.constant 0 : i32
    return %c0_i32, %c0_i32_0 : i32, i32
  }
  func.func @transform_5(%arg0: i32, %arg1: i32) -> (i32, i32) {
    %c0_i32 = arith.constant 0 : i32
    %c0_i32_0 = arith.constant 0 : i32
    return %arg0, %c0_i32 : i32, i32
  }
}

</mosaic_0001>

<bundles_post_ra>
// kernel: tpu_custom_call.1
= control target key start
LH: loop header
LB: loop body
LE: loop exit
PB: predicated region body
PF: predicated region fallthrough
CT: control target
= control target key end

     0   :  { %10 = vsyncpa [#allocation3], 0  ;;  %s474_s0 = inlined_call_operand.vmem [shape: bf16[4,16,7], index: 0, kind: input, shape index: {}]   ;;  %s475_s1 = inlined_call_operand.vmem [shape: bf16[7,128], index: 1, kind: input, shape index: {}]   ;;  %s476_s2 = inlined_call_operand.vmem [shape: f32[1,128], index: 2, kind: input, shape index: {}]   ;;  %s477_s3 = inlined_call_operand.hbm [shape: bf16[128,128], index: 3, kind: input, shape index: {}]   ;;  %s478_s4 = inlined_call_operand.vmem [shape: f32[1,128], index: 4, kind: input, shape index: {}]   ;;  %s479_s5 = inlined_call_operand.hbm [shape: f32[16,128], index: 5, kind: output, shape index: {}]  }
   0x1   :  { %11 = vsyncpa [#allocation4], 0  ;;  %s22_s20 = sshll.u32 %s477_s3, 4  ;;  %s406_s21 = smov [#allocation2]   ;;  %s23_s20 = int_to_ptr.hbm [resolvable:$true] %s22_s20 }
   0x2   :  { %s24_s22 = sshll.u32 %s406_s21, 4  ;;  %s407_s23 = smov 64   ;;  %s25_s22 = int_to_ptr.vmem [resolvable:$true] %s24_s22 }
   0x3   :  { %s408_s24 = smov 4  }
   0x4   :  { %30 = dma.hbm_to_vmem [thread:$0]  %s23_s20, 1024, %s25_s22, [#allocation3], %s407_s23, %s407_s23, %s408_s24  }
   0x5   :  { %402 = dma.done.wait [#allocation3], 1024  }
   0x6   :  { %403 = vsyncadd [#allocation3], 4294966272  ;;  %vm84_vm0 = vcmask 1042432   ;;  %vm85_vm1 = vcmask 1043456   ;;  %v409_v0 = vmov 65535   ;;  %v317_v5 = vld [vmem:[%s474_s0 + $0x8] sm:$0xff] }
   0x7   :  { %v86_v1 = vsel %vm84_vm0, 4294967295, %v409_v0  ;;  %v46_v3 = vld [vmem:[%s475_s1] sm:$0xf]  ;;  %vm71_vm2 = vcmask 56320   ;;  %v327_v7 = vld [vmem:[#allocation2 + $0x38] sm:$0xff]  ;;  %v326_v8 = vld [vmem:[#allocation2 + $0x30] sm:$0xff] }
   0x8   :  { %v87_v2 = vsel %vm85_vm1, %v86_v1, 0  ;;  %v316_v6 = vld [vmem:[%s474_s0] sm:$0xff]  ;;  %329 = vmatpush.bf16.msra.mxu1 %v327_v7  ;;  %330 = vmatpush.bf16.msra.mxu2 %v327_v7  ;;  %v325_v9 = vld [vmem:[#allocation2 + $0x28] sm:$0xff]  ;;  %v318_v11 = vld [vmem:[%s474_s0 + $0x10] sm:$0xff]  ;;  %s251_s13 = sshll.u32 %s479_s5, 4  ;;  %s411_s14 = smov 128   ;;  %s252_s13 = int_to_ptr.hbm [resolvable:$true] %s251_s13 }
   0x9   :  { %v89_v4 = vand.u32 %v87_v2, %v46_v3  ;;  %v324_v10 = vld [vmem:[#allocation2 + $0x20] sm:$0xff]  ;;  %v319_v12 = vld [vmem:[%s474_s0 + $0x18] sm:$0xff]  ;;  %v322_v14 = vld [vmem:[#allocation2 + $0x10] sm:$0xff]  ;;  %s412_s15 = smov 8  }
   0xa   :  { %v323_v13 = vld [vmem:[#allocation2 + $0x18] sm:$0xff]  ;;  %v321_v15 = vld [vmem:[#allocation2 + $0x8] sm:$0xff]  ;;  %v320_v16 = vld [vmem:[#allocation2] sm:$0xff] }
   0xb   :  { %328 = vmatpush.bf16.msra.mxu3 %v89_v4  ;;  %98 = vmatpush.bf16.msra.mxu0 %v89_v4  ;;  %v352_v18 = vld [vmem:[%s476_s2] ss:$0 sm:$0xff] }
   0xc   :  { %331 = vmatpush.bf16.msra.mxu1 %v326_v8  ;;  %332 = vmatpush.bf16.msra.mxu2 %v326_v8  ;;  %v353_v50 = vld [vmem:[%s478_s4] ss:$0 sm:$0xff]  ;;  %s410_s4 = smov [#allocation5]  }
   0xd   :  { %s249_s10 = sshll.u32 %s410_s4, 4  ;;  %s250_s10 = int_to_ptr.vmem [resolvable:$true] %s249_s10 }
   0xe   :  { %281 = vmatmul.msk.bf16.vlgmr.msra.gmra.mxu3 %vm71_vm2, %v317_v5  ;;  %280 = vmatmul.msk.bf16.vlgmr.msra.gmra.mxu0 %vm71_vm2, %v316_v6 }
   0xf   :  { %200 = vmatpush.bf16.msrb.mxu0 %v327_v7 }
  0x10   :  { %333 = vmatpush.bf16.msra.mxu1 %v325_v9  ;;  %334 = vmatpush.bf16.msra.mxu2 %v325_v9 }
  0x13   :  { %201 = vmatpush.bf16.msrb.mxu0 %v326_v8 }
  0x14   :  { %335 = vmatpush.bf16.msra.mxu1 %v324_v10  ;;  %336 = vmatpush.bf16.msra.mxu2 %v324_v10 }
  0x17   :  { %202 = vmatpush.bf16.msrb.mxu0 %v325_v9 }
  0x18   :  { %337 = vmatpush.bf16.msra.mxu1 %v323_v13  ;;  %338 = vmatpush.bf16.msra.mxu2 %v323_v13 }
  0x1b   :  { %203 = vmatpush.bf16.msrb.mxu0 %v324_v10 }
  0x1c   :  { %339 = vmatpush.bf16.msra.mxu1 %v322_v14  ;;  %340 = vmatpush.bf16.msra.mxu2 %v322_v14 }
  0x1e   :  { %282 = vmatmul.msk.bf16.gmra.mxu3 %vm71_vm2, %v318_v11 }
  0x1f   :  { %204 = vmatpush.bf16.msrb.mxu0 %v323_v13 }
  0x20   :  { %341 = vmatpush.bf16.msra.mxu1 %v321_v15  ;;  %342 = vmatpush.bf16.msra.mxu2 %v321_v15 }
  0x23   :  { %205 = vmatpush.bf16.msrb.mxu0 %v322_v14 }
  0x24   :  { %343 = vmatpush.bf16.msra.mxu1 %v320_v16  ;;  %344 = vmatpush.bf16.msra.mxu2 %v320_v16 }
  0x27   :  { %206 = vmatpush.bf16.msrb.mxu0 %v321_v15 }
  0x2b   :  { %207 = vmatpush.bf16.msrb.mxu0 %v320_v16 }
  0x2e   :  { %283 = vmatmul.msk.bf16.gmra.mxu3 %vm71_vm2, %v319_v12 }
  0x8b   :  { %v100_v17 = vpop.f32.mrf.mxu0 }
  0x8c   :  { %v101_v19 = vadd.f32 %v352_v18, %v100_v17 }
  0x8e   :  { %v120_v22 = vmax.f32 %v101_v19, 0.0 }
  0x91   :  { %v105_v20 = vpop.f32.mrf.mxu3 }
  0x92   :  { %v106_v25 = vadd.f32 %v352_v18, %v105_v20 }
  0x93   :  { %v102_v21 = vpop.f32.mrf.mxu0 }
  0x94   :  { %v103_v23 = vadd.f32 %v352_v18, %v102_v21  ;;  %v122_v29 = vmax.f32 %v106_v25, 0.0 }
  0x96   :  { %v121_v24 = vmax.f32 %v103_v23, 0.0 }
  0x98   :  { %v128_v26 = vpack.c.bf16 %v121_v24, %v120_v22 }
  0x99   :  { %v107_v27 = vpop.f32.mrf.mxu3 }
  0x9a   :  { %v108_v28 = vadd.f32 %v352_v18, %v107_v27  ;;  %208 = vmatmul.bf16.vlgmr.msrb.gmra.mxu0 %v128_v26 }
  0x9c   :  { %v123_v30 = vmax.f32 %v108_v28, 0.0 }
  0x9e   :  { %v129_v31 = vpack.c.bf16 %v123_v30, %v122_v29 }
  0xa0   :  { %213 = vmatmul.bf16.vlgmr.msra.gmra.mxu1 %v129_v31 }
  0xa1   :  { %v110_v32 = vpop.f32.mrf.mxu3 }
  0xa2   :  { %v111_v33 = vadd.f32 %v352_v18, %v110_v32 }
  0xa4   :  { %v124_v36 = vmax.f32 %v111_v33, 0.0 }
  0xa9   :  { %v112_v34 = vpop.f32.mrf.mxu3 }
  0xaa   :  { %v113_v35 = vadd.f32 %v352_v18, %v112_v34 }
  0xac   :  { %v125_v37 = vmax.f32 %v113_v35, 0.0 }
  0xae   :  { %v130_v38 = vpack.c.bf16 %v125_v37, %v124_v36 }
  0xb0   :  { %218 = vmatmul.bf16.vlgmr.msra.gmra.mxu2 %v130_v38 }
  0xb1   :  { %v115_v39 = vpop.f32.mrf.mxu3 }
  0xb2   :  { %v116_v40 = vadd.f32 %v352_v18, %v115_v39 }
  0xb4   :  { %v126_v43 = vmax.f32 %v116_v40, 0.0 }
  0xb9   :  { %v117_v41 = vpop.f32.mrf.mxu3 }
  0xba   :  { %v118_v42 = vadd.f32 %v352_v18, %v117_v41 }
  0xbc   :  { %v127_v44 = vmax.f32 %v118_v42, 0.0 }
  0xbe   :  { %v131_v45 = vpack.c.bf16 %v127_v44, %v126_v43 }
  0xc0   :  { %223 = vmatmul.bf16.gmra.mxu2 %v131_v45 }
 0x117   :  { %v209_v47 = vpop.f32.mrf.mxu0 }
 0x118   :  { %v210_v51 = vadd.f32 %v353_v50, %v209_v47 }
 0x11a   :  { %v229_v55 = vmax.f32 %v210_v51, 0.0 }
 0x11d   :  { %v214_v49 = vpop.f32.mrf.mxu1 }
 0x11e   :  { %v215_v53 = vadd.f32 %v353_v50, %v214_v49 }
 0x11f   :  { %v211_v58 = vpop.f32.mrf.mxu0 }
 0x120   :  { %v231_v59 = vmax.f32 %v215_v53, 0.0  ;;  %v212_v63 = vadd.f32 %v353_v50, %v211_v58 }
 0x122   :  { %v230_v5 = vmax.f32 %v212_v63, 0.0 }
 0x125   :  { %v216_v61 = vpop.f32.mrf.mxu1 }
 0x126   :  { %v217_v2 = vadd.f32 %v353_v50, %v216_v61 }
 0x128   :  { %v232_v8 = vmax.f32 %v217_v2, 0.0 }
 0x133   :  { %v219_v46 = vpop.f32.mrf.mxu2 }
 0x134   :  { %v220_v52 = vadd.f32 %v353_v50, %v219_v46 }
 0x136   :  { %v233_v56 = vmax.f32 %v220_v52, 0.0 }
 0x138   :  { %v237_v62 = vmax.f32 %v229_v55, %v233_v56 }
 0x13b   :  { %v221_v48 = vpop.f32.mrf.mxu2 }
 0x13c   :  { %v222_v0 = vadd.f32 %v353_v50, %v221_v48 }
 0x13e   :  { %v234_v6 = vmax.f32 %v222_v0, 0.0 }
 0x140   :  { %v240_v10 = vmax.f32 %v230_v5, %v234_v6 }
 0x143   :  { %v224_v54 = vpop.f32.mrf.mxu2 }
 0x144   :  { %v225_v57 = vadd.f32 %v353_v50, %v224_v54 }
 0x146   :  { %v235_v60 = vmax.f32 %v225_v57, 0.0 }
 0x148   :  { %v238_v1 = vmax.f32 %v231_v59, %v235_v60 }
 0x14a   :  { %v239_v3 = vmax.f32 %v237_v62, %v238_v1 }
 0x14b   :  { %v226_v4 = vpop.f32.mrf.mxu2 }
 0x14c   :  { %243 = vst [vmem:[#allocation5] sm:$0xff] %v239_v3  ;;  %v227_v7 = vadd.f32 %v353_v50, %v226_v4 }
 0x14e   :  { %v236_v9 = vmax.f32 %v227_v7, 0.0 }
 0x150   :  { %v241_v11 = vmax.f32 %v232_v8, %v236_v9 }
 0x152   :  { %v242_v12 = vmax.f32 %v240_v10, %v241_v11 }
 0x154   :  { %244 = vst [vmem:[#allocation5 + $0x8] sm:$0xff] %v242_v12 }
 0x155   :  { %257 = dma.vmem_to_hbm [thread:$0]  %s250_s10, 256, %s252_s13, [#allocation4], %s411_s14, %s411_s14, %s412_s15  }
 0x156   :  { %404 = dma.done.wait [#allocation4], 256  }
 0x157   :  { %405 = vsyncadd [#allocation4], 4294967040 }
 0x158   :  { %262 = vsyncpa [#allocation3], 1 }
 0x159   :  { %263 = vsyncpa [#allocation4], 1 }

</bundles_post_ra>
